<compile_context>
chip_gen: v6e
topology: v6e:2x2x1
jax: 0.10.0
libtpu: 0.0.40
codegen_flags: <defaults>
</compile_context>

<pallas_src>
import numpy as np
import jax
import jax.numpy as jnp
from jax.experimental import pallas as pl
from jax.experimental.pallas import tpu as pltpu  # noqa: F401  (TPU backend)


def _make_cpc_kernel(T, N):
    """Builds the CPC loss kernel; T (timesteps) and N (unique labels) baked in."""
    inv_norm = 1.0 / float(N * T)

    def kernel(z_ref, p_ref, out_ref):
        zv = z_ref[...]          # (T, N, D), native dtype (f32 or bf16)
        pv = p_ref[...]          # (T, N, D)

        # All T score matrices in one batched MXU contraction over D:
        #   S[t, i, j] = <z[t, i], p[t, j]>   ("NT" form -> no transpose of p)
        s = jnp.einsum('tnd,tmd->tnm', zv, pv,
                       preferred_element_type=jnp.float32)      # (T, N, N) f32

        # Stable row-wise logsumexp over the negatives axis j.
        m = jnp.max(s, axis=-1, keepdims=True)                  # (T, N, 1)
        lse = m + jnp.log(jnp.sum(jnp.exp(s - m), axis=-1, keepdims=True))

        # Positive (diagonal) term computed directly from the inputs:
        #   S[t, i, i] = sum_d z[t, i, d] * p[t, i, d]
        # (replaces the (N, N) iota masks + masked row-sum of the old kernel)
        zf = zv.astype(jnp.float32)
        pf = pv.astype(jnp.float32)
        diag = jnp.sum(zf * pf, axis=-1, keepdims=True)          # (T, N, 1)

        # loss = sum_{t,i} (logsumexp_j S[t,i,j] - S[t,i,i]) / (N * T)
        loss = jnp.sum(lse - diag) * jnp.float32(inv_norm)       # scalar
        out_ref[...] = loss + jnp.zeros_like(out_ref)            # splat to (1,1)

    return kernel


def cpc_loss_pallas(Z_future_timesteps, predicted_future_Z, batch_labels,
                    future_predicted_timesteps=12):
    """Pallas implementation of CPC_loss.forward.

    Z_future_timesteps:  jnp.ndarray [T_total, B, D]
    predicted_future_Z:  jnp.ndarray [T_pred,  B, D]
    batch_labels:        Python list of labels (length B)
    """
    # --- host-side glue: replicate the module's label dedup exactly ---
    if isinstance(future_predicted_timesteps, int):
        fpt = list(np.arange(1, future_predicted_timesteps + 1))
    else:
        fpt = list(future_predicted_timesteps)

    labels = list(batch_labels)
    unique_labels = list(dict.fromkeys(labels))
    idx_unique = [labels.index(x) for x in unique_labels]

    T = len(fpt)
    N = len(idx_unique)
    D = Z_future_timesteps.shape[-1]

    idx = jnp.asarray(idx_unique, dtype=jnp.int32)
    k_idx = jnp.asarray([int(k) - 1 for k in fpt], dtype=jnp.int32)

    # Static-index row gathers (cheap XLA gathers) producing two contiguous
    # [T, N, D] slabs.  Dtype is passed through unchanged (no forced f32
    # upcast), so bf16 inputs keep halved DMA bytes; the kernel does f32 math.
    # TODO(synk): for B >> N the gather could be moved in-kernel via scalar
    # prefetch + pl.Element index maps, but that reintroduces a per-row grid.
    z_sel = Z_future_timesteps[k_idx][:, idx, :]
    p_sel = predicted_future_Z[:T][:, idx, :]

    kernel = _make_cpc_kernel(T, N)

    out = pl.pallas_call(
        kernel,
        out_shape=jax.ShapeDtypeStruct((1, 1), jnp.float32),
        grid=(1,),
        in_specs=[
            pl.BlockSpec((T, N, D), lambda i: (0, 0, 0)),
            pl.BlockSpec((T, N, D), lambda i: (0, 0, 0)),
        ],
        out_specs=pl.BlockSpec((1, 1), lambda i: (0, 0)),
    )(z_sel, p_sel)

    return out[0, 0]


def cpc_loss_reference(Z_future_timesteps, predicted_future_Z, batch_labels,
                       future_predicted_timesteps=12):
    """Pure-JAX reference mirroring the PyTorch forward (for verification)."""
    if isinstance(future_predicted_timesteps, int):
        fpt = list(np.arange(1, future_predicted_timesteps + 1))
    else:
        fpt = list(future_predicted_timesteps)
    labels = list(batch_labels)
    unique_labels = list(dict.fromkeys(labels))
    idx = [labels.index(x) for x in unique_labels]
    loss = 0.0
    i = 0
    for k in fpt:
        z = Z_future_timesteps[k - 1][jnp.asarray(idx)]
        p = predicted_future_Z[i][jnp.asarray(idx)]
        s = z @ p.T
        lsm = jax.nn.log_softmax(s, axis=1)
        loss = loss - jnp.sum(jnp.diag(lsm))
        i += 1
    return loss / (len(idx) * len(fpt))


if __name__ == "__main__":
    # Small, deterministic shapes consistent with the module:
    # T = 4 future timesteps, batch B = 10, embedding dim D = 32.
    T, B, D = 4, 10, 32
    key = jax.random.PRNGKey(0)
    k1, k2 = jax.random.split(key)
    Z_future_timesteps = jax.random.normal(k1, (T, B, D), dtype=jnp.float32)
    predicted_future_Z = jax.random.normal(k2, (T, B, D), dtype=jnp.float32)
    # Labels with duplicates -> 8 unique labels kept (first occurrence of each)
    batch_labels = [0, 1, 2, 3, 0, 4, 5, 1, 6, 7]

    loss = cpc_loss_pallas(Z_future_timesteps, predicted_future_Z,
                           batch_labels, future_predicted_timesteps=T)
    loss = jax.block_until_ready(loss)

    ref = cpc_loss_reference(Z_future_timesteps, predicted_future_Z,
                             batch_labels, future_predicted_timesteps=T)
    np.testing.assert_allclose(np.asarray(loss), np.asarray(ref),
                               rtol=1e-5, atol=1e-5)
    print("KERNEL_OK")
</pallas_src>

<mosaic_0001>
module attributes {stable_mosaic.version = 11 : i64} {
  func.func @kernel(%arg0: i32, %arg1: memref<4x8x32xf32, #tpu.memory_space<vmem>>, %arg2: memref<4x8x32xf32, #tpu.memory_space<vmem>>, %arg3: memref<1x1xf32, #tpu.memory_space<vmem>>) attributes {dimension_semantics = [#tpu.dimension_semantics<arbitrary>], iteration_bounds = array<i64: 1>, scalar_prefetch = 0 : i64, scratch_operands = 0 : i64, tpu.core_type = #tpu.core_type<tc>, window_params = [{pipeline_mode = #tpu.pipeline_mode<synchronous>, transform_indices = @transform_0, window_bounds = array<i64: 4, 8, 32>}, {pipeline_mode = #tpu.pipeline_mode<synchronous>, transform_indices = @transform_1, window_bounds = array<i64: 4, 8, 32>}, {pipeline_mode = #tpu.pipeline_mode<synchronous>, transform_indices = @transform_2, window_bounds = array<i64: 1, 1>}]} {
    %c0 = arith.constant 0 : index
    %c0_0 = arith.constant 0 : index
    %c0_1 = arith.constant 0 : index
    %0 = vector.load %arg1[%c0, %c0_0, %c0_1] : memref<4x8x32xf32, #tpu.memory_space<vmem>>, vector<4x8x32xf32>
    %c0_2 = arith.constant 0 : index
    %c0_3 = arith.constant 0 : index
    %c0_4 = arith.constant 0 : index
    %1 = vector.load %arg2[%c0_2, %c0_3, %c0_4] : memref<4x8x32xf32, #tpu.memory_space<vmem>>, vector<4x8x32xf32>
    "tpu.trace_start"() <{level = 10 : i32, message = "tnd,tmd->tnm"}> : () -> ()
    %cst = arith.constant dense<0.000000e+00> : vector<4x8x8xf32>
    %2 = tpu.matmul %0, %1, %cst {dimension_numbers = #tpu.dot_dimension_numbers<[2], [2], [1], [1], [0, 0, 0, 1, 1, 1], [0], [0]>} : vector<4x8x32xf32>, vector<4x8x32xf32>, vector<4x8x8xf32> -> vector<4x8x8xf32>
    "tpu.trace_stop"() : () -> ()
    %cst_5 = arith.constant dense<0xFF800000> : vector<4x8xf32>
    %3 = vector.multi_reduction <maximumf>, %2, %cst_5 [2] : vector<4x8x8xf32> to vector<4x8xf32>
    %4 = vector.shape_cast %3 : vector<4x8xf32> to vector<4x8x1xf32>
    %5 = vector.broadcast %4 : vector<4x8x1xf32> to vector<4x8x8xf32>
    %6 = arith.subf %2, %5 : vector<4x8x8xf32>
    %7 = math.exp %6 : vector<4x8x8xf32>
    %cst_6 = arith.constant dense<0.000000e+00> : vector<4x8xf32>
    %8 = vector.multi_reduction <add>, %7, %cst_6 [2] : vector<4x8x8xf32> to vector<4x8xf32>
    %9 = vector.shape_cast %8 : vector<4x8xf32> to vector<4x8x1xf32>
    %10 = math.log %9 : vector<4x8x1xf32>
    %11 = arith.addf %4, %10 : vector<4x8x1xf32>
    %12 = arith.mulf %0, %1 : vector<4x8x32xf32>
    %cst_7 = arith.constant dense<0.000000e+00> : vector<4x8xf32>
    %13 = vector.multi_reduction <add>, %12, %cst_7 [2] : vector<4x8x32xf32> to vector<4x8xf32>
    %14 = vector.shape_cast %13 : vector<4x8xf32> to vector<4x8x1xf32>
    %15 = arith.subf %11, %14 : vector<4x8x1xf32>
    %16 = vector.shape_cast %15 : vector<4x8x1xf32> to vector<1x4x8x1xf32>
    %cst_8 = arith.constant dense<0.000000e+00> : vector<1xf32>
    %17 = vector.multi_reduction <add>, %16, %cst_8 [1, 2, 3] : vector<1x4x8x1xf32> to vector<1xf32>
    %18 = vector.shape_cast %17 : vector<1xf32> to vector<1x1x1x1xf32>
    %19 = vector.extract %18[0, 0, 0, 0] : f32 from vector<1x1x1x1xf32>
    %cst_9 = arith.constant 3.125000e-02 : f32
    %20 = arith.mulf %19, %cst_9 : f32
    %cst_10 = arith.constant 0.000000e+00 : f32
    %21 = vector.broadcast %cst_10 : f32 to vector<1x1xf32>
    %22 = vector.broadcast %20 : f32 to vector<1x1xf32>
    %23 = arith.addf %22, %21 : vector<1x1xf32>
    %c0_11 = arith.constant 0 : index
    %c0_12 = arith.constant 0 : index
    %24 = vector.load %arg3[%c0_11, %c0_12] : memref<1x1xf32, #tpu.memory_space<vmem>>, vector<1x1xf32>
    tpu.vector_store %arg3[%c0_11, %c0_12], %23 {strides = array<i32>} : memref<1x1xf32, #tpu.memory_space<vmem>>, vector<1x1xf32>,
    return
  }
  func.func @transform_0(%arg0: i32) -> (i32, i32, i32) {
    %c0_i32 = arith.constant 0 : i32
    %c0_i32_0 = arith.constant 0 : i32
    %c0_i32_1 = arith.constant 0 : i32
    %c0_i32_2 = arith.constant 0 : i32
    return %c0_i32, %c0_i32_0, %c0_i32_1 : i32, i32, i32
  }
  func.func @transform_1(%arg0: i32) -> (i32, i32, i32) {
    %c0_i32 = arith.constant 0 : i32
    %c0_i32_0 = arith.constant 0 : i32
    %c0_i32_1 = arith.constant 0 : i32
    %c0_i32_2 = arith.constant 0 : i32
    return %c0_i32, %c0_i32_0, %c0_i32_1 : i32, i32, i32
  }
  func.func @transform_2(%arg0: i32) -> (i32, i32) {
    %c0_i32 = arith.constant 0 : i32
    %c0_i32_0 = arith.constant 0 : i32
    %c0_i32_1 = arith.constant 0 : i32
    return %c0_i32, %c0_i32_0 : i32, i32
  }
}

</mosaic_0001>

<bundles_post_ra>
// kernel: tpu_custom_call.1
= control target key start
LH: loop header
LB: loop body
LE: loop exit
PB: predicated region body
PF: predicated region fallthrough
CT: control target
= control target key end

     0   :  { %7 = vsyncpa [#allocation3], 0  ;;  %s642_s0 = inlined_call_operand.hbm [shape: f32[4,8,32], index: 0, kind: input, shape index: {}]   ;;  %s643_s1 = inlined_call_operand.hbm [shape: f32[4,8,32], index: 1, kind: input, shape index: {}]   ;;  %s644_s2 = inlined_call_operand.hbm [shape: f32[1,1], index: 2, kind: output, shape index: {}]  }
   0x1   :  { %8 = vsyncpa [#allocation6], 0 }
   0x2   :  { %9 = vsyncpa [#allocation4], 0  ;;  %s587_s9 = smov [#allocation2]  }
   0x3   :  { %s15_s10 = sshll.u32 %s587_s9, 4  ;;  %s16_s10 = int_to_ptr.vmem [resolvable:$true] %s15_s10 }
   0x4   :  { %s529_s11 = scalar_lea.vmem %s16_s10, 512  ;;  %p534_p1 = scmp.lt.s32.totalorder %s16_s10, %s16_s10 }
   0x5   :  { %p530_p0 = scmp.ne.s32.totalorder %s16_s10, %s529_s11  ;;  %p535_p2 = scmp.lt.s32.totalorder %s529_s11, %s529_s11 }
   0x7   :  { %p536_p3 = por %p535_p2, %p534_p1 }
   0x9   :  { %p537_p4 = pnand %p536_p3, %p530_p0 }
   0xb   :  { %540 = shalt.err (!%p537_p4)
}
   0xc   :  { %s588_s12 = smov 128   ;;  %s589_s13 = smov 8  }
   0xd   :  { %21 = dma.hbm_to_vmem [thread:$0]  %s642_s0, 512, %s16_s10, [#allocation3], %s588_s12, %s588_s12, %s589_s13  }
   0xe   :  { %s590_s16 = smov [#allocation5]  }
   0xf   :  { %s27_s17 = sshll.u32 %s590_s16, 4  ;;  %s28_s17 = int_to_ptr.vmem [resolvable:$true] %s27_s17 }
  0x10   :  { %s549_s18 = scalar_lea.vmem %s28_s17, 512  ;;  %p554_p6 = scmp.lt.s32.totalorder %s28_s17, %s28_s17 }
  0x11   :  { %p550_p5 = scmp.ne.s32.totalorder %s28_s17, %s549_s18  ;;  %p555_p7 = scmp.lt.s32.totalorder %s549_s18, %s549_s18 }
  0x13   :  { %p556_p8 = por %p555_p7, %p554_p6 }
  0x15   :  { %p557_p9 = pnand %p556_p8, %p550_p5 }
  0x17   :  { %560 = shalt.err (!%p557_p9)
}
  0x18   :  { %33 = dma.hbm_to_vmem [thread:$0]  %s643_s1, 512, %s28_s17, [#allocation6], %s588_s12, %s588_s12, %s589_s13  }
  0x19   :  { %581 = dma.done.wait [#allocation3], 512  }
  0x1a   :  { %582 = vsyncadd [#allocation3], 4294966784 }
  0x1b   :  { %583 = dma.done.wait [#allocation6], 512  }
  0x1c   :  { %584 = vsyncadd [#allocation6], 4294966784  ;;  %v591_v0 = vmov 0.0   ;;  %vm592_vm0 = vmmov 0   ;;  %vm48_vm1 = vcmask 261120   ;;  %v44_v1 = vld [vmem:[#allocation5] sm:$0xff] }
  0x1d   :  { %476 = vmatprep.subr.mxu0 %v591_v0  ;;  %478 = vmatprep.mubr.msk.f32.mxu0 %vm592_vm0, %v591_v0  ;;  %v45_v2 = vld [vmem:[#allocation5 + $0x8] sm:$0xff]  ;;  %v40_v3 = vld [vmem:[#allocation2] sm:$0xff]  ;;  %v46_v5 = vld [vmem:[#allocation5 + $0x10] sm:$0xff]  ;;  %vm353_vm2 = vcmask 64512   ;;  %vm422_vm3 = vcmask 7168   ;;  %s593_s0 = smov [#allocation7]  }
  0x1e   :  { %481 = vmatprep.subr.mxu1 %v591_v0  ;;  %483 = vmatprep.mubr.msk.f32.mxu1 %vm592_vm0, %v591_v0  ;;  %v41_v4 = vld [vmem:[#allocation2 + $0x8] sm:$0xff]  ;;  %v47_v6 = vld [vmem:[#allocation5 + $0x18] sm:$0xff]  ;;  %v42_v7 = vld [vmem:[#allocation2 + $0x10] sm:$0xff]  ;;  %v402_v36 = vmul.f32 %v44_v1, %v40_v3  ;;  %s450_s1 = sshll.u32 %s593_s0, 4  ;;  %vm442_vm4 = vcmask 0   ;;  %s451_s1 = int_to_ptr.vmem [resolvable:$true] %s450_s1 }
  0x1f   :  { %477 = vmatpush3.xpose.msk.msra.mxu0 %vm48_vm1, %v44_v1  ;;  %482 = vmatpush3.xpose.msk.msra.mxu1 %vm48_vm1, %v45_v2  ;;  %v43_v8 = vld [vmem:[#allocation2 + $0x18] sm:$0xff]  ;;  %v403_v40 = vmul.f32 %v45_v2, %v41_v4  ;;  %v404_v43 = vmul.f32 %v46_v5, %v42_v7  ;;  %s561_s23 = scalar_lea.vmem %s451_s1, 16  ;;  %s565_s24 = scalar_lea.vmem %s451_s1, 32 }
  0x20   :  { %486 = vmatprep.subr.mxu0 %v591_v0  ;;  %491 = vmatprep.subr.mxu1 %v591_v0  ;;  %v406_v42 = vsel %vm48_vm1, %v402_v36, 0.0  ;;  %v405_v46 = vmul.f32 %v47_v6, %v43_v8  ;;  %p562_p10 = scmp.ne.s32.totalorder %s451_s1, %s561_s23  ;;  %p566_p11 = scmp.lt.s32.totalorder %s451_s1, %s451_s1 }
  0x21   :  { %v409_v45 = vsel %vm48_vm1, %v403_v40, 0.0  ;;  %v412_v47 = vsel %vm48_vm1, %v404_v43, 0.0  ;;  %p567_p12 = scmp.lt.s32.totalorder %s565_s24, %s561_s23 }
  0x22   :  { %479 = vmatmul.mubr.msk.f32.vlgmr.msra.gmra.mxu0 %vm48_vm1, %v40_v3  ;;  %484 = vmatmul.mubr.msk.f32.vlgmr.msra.gmra.mxu1 %vm48_vm1, %v41_v4  ;;  %v415_v48 = vsel %vm48_vm1, %v405_v46, 0.0 }
  0x23   :  { %487 = vmatpush3.xpose.msk.msra.mxu0 %vm48_vm1, %v46_v5  ;;  %488 = vmatprep.mubr.msk.f32.mxu0 %vm592_vm0, %v591_v0  ;;  %p568_p13 = por %p567_p12, %p566_p11 }
  0x24   :  { %492 = vmatpush3.xpose.msk.msra.mxu1 %vm48_vm1, %v47_v6  ;;  %493 = vmatprep.mubr.msk.f32.mxu1 %vm592_vm0, %v591_v0 }
  0x25   :  { %p569_p0 = pnand %p568_p13, %p562_p10 }
  0x26   :  { %489 = vmatmul.mubr.msk.f32.vlgmr.msra.gmra.mxu0 %vm48_vm1, %v42_v7 }
  0x27   :  { %494 = vmatmul.mubr.msk.f32.vlgmr.msra.gmra.mxu1 %vm48_vm1, %v43_v8 }
  0xe2   :  { %v121_v9 = vpop.f32.mrf.mxu0  ;;  %v197_v10 = vpop.f32.mrf.mxu1 }
  0xe3   :  { %v354_v11 = vsel %vm353_vm2, %v121_v9, -inf  ;;  %v357_v14 = vsel %vm353_vm2, %v197_v10, -inf }
  0xe4   :  { %355 = vmax.xlane.f32.xlu0 %v354_v11  ;;  %v480_v12 = vpop.f32.mrf.mxu0  ;;  %v485_v13 = vpop.f32.mrf.mxu1 }
  0xe6   :  { %v273_v15 = vpop.f32.mrf.mxu0 }
  0xe7   :  { %v360_v16 = vsel %vm353_vm2, %v273_v15, -inf  ;;  %v349_v17 = vpop.f32.mrf.mxu1 }
  0xe8   :  { %358 = vmax.xlane.f32.xlu0 %v357_v14  ;;  %361 = vmax.xlane.f32.xlu1 %v360_v16  ;;  %v490_v18 = vpop.f32.mrf.mxu0  ;;  %v363_v20 = vsel %vm353_vm2, %v349_v17, -inf }
  0xe9   :  { %v495_v19 = vpop.f32.mrf.mxu1 }
  0xec   :  { %364 = vmax.xlane.f32.xlu1 %v363_v20 }
 0x16d   :  { %v356_v21 = vpop.xlane.xlu0 %355 }
 0x16e   :  { %v366_v22 = vsub.f32 %v121_v9, %v356_v21 }
 0x170   :  { %v370_v23 = vmul.f32 1.442695, %v366_v22 }
 0x171   :  { %v359_v24 = vpop.xlane.xlu0 %358  ;;  %v362_v25 = vpop.xlane.xlu1 %361 }
 0x172   :  { %505 = vpow2.f32 %v370_v23  ;;  %v367_v26 = vsub.f32 %v197_v10, %v359_v24  ;;  %v368_v27 = vsub.f32 %v273_v15, %v362_v25 }
 0x174   :  { %v372_v28 = vmul.f32 1.442695, %v367_v26  ;;  %v374_v29 = vmul.f32 1.442695, %v368_v27 }
 0x175   :  { %v365_v30 = vpop.xlane.xlu1 %364 }
 0x176   :  { %507 = vpow2.f32 %v372_v28  ;;  %v369_v31 = vsub.f32 %v349_v17, %v365_v30 }
 0x177   :  { %509 = vpow2.f32 %v374_v29 }
 0x178   :  { %v376_v32 = vmul.f32 1.442695, %v369_v31 }
 0x17a   :  { %511 = vpow2.f32 %v376_v32 }
 0x17f   :  { %v506_v33 = vpop.eup %505 }
 0x180   :  { %v378_v34 = vsel %vm353_vm2, %v506_v33, 0.0 }
 0x181   :  { %379 = vadd.xlane.f32.xlu0 %v378_v34 }
 0x183   :  { %v508_v35 = vpop.eup %507 }
 0x184   :  { %v510_v37 = vpop.eup %509  ;;  %v381_v38 = vsel %vm353_vm2, %v508_v35, 0.0 }
 0x185   :  { %382 = vadd.xlane.f32.xlu1 %v381_v38  ;;  %v384_v39 = vsel %vm353_vm2, %v510_v37, 0.0 }
 0x186   :  { %385 = vadd.xlane.f32.xlu0 %v384_v39 }
 0x187   :  { %v512_v41 = vpop.eup %511 }
 0x188   :  { %v387_v44 = vsel %vm353_vm2, %v512_v41, 0.0 }
 0x189   :  { %388 = vadd.xlane.f32.xlu1 %v387_v44 }
 0x18a   :  { %407 = vadd.xlane.f32.xlu0 %v406_v42 }
 0x18d   :  { %410 = vadd.xlane.f32.xlu1 %v409_v45 }
 0x18e   :  { %413 = vadd.xlane.f32.xlu0 %v412_v47 }
 0x191   :  { %416 = vadd.xlane.f32.xlu1 %v415_v48 }
 0x20a   :  { %v380_v49 = vpop.xlane.xlu0 %379 }
 0x20b   :  { %513 = vlog2.f32 %v380_v49 }
 0x20e   :  { %v383_v50 = vpop.xlane.xlu1 %382 }
 0x20f   :  { %v386_v51 = vpop.xlane.xlu0 %385  ;;  %515 = vlog2.f32 %v383_v50 }
 0x210   :  { %517 = vlog2.f32 %v386_v51 }
 0x212   :  { %v389_v52 = vpop.xlane.xlu1 %388 }
 0x213   :  { %519 = vlog2.f32 %v389_v52  ;;  %v408_v55 = vpop.xlane.xlu0 %407 }
 0x216   :  { %v411_v58 = vpop.xlane.xlu1 %410 }
 0x217   :  { %v414_v63 = vpop.xlane.xlu0 %413 }
 0x218   :  { %v514_v53 = vpop.eup %513 }
 0x219   :  { %v391_v54 = vmul.f32 0.6931472, %v514_v53 }
 0x21a   :  { %v417_v6 = vpop.xlane.xlu1 %416 }
 0x21b   :  { %v398_v56 = vadd.f32 %v391_v54, %v356_v21 }
 0x21c   :  { %v516_v57 = vpop.eup %515 }
 0x21d   :  { %v518_v59 = vpop.eup %517  ;;  %v393_v60 = vmul.f32 0.6931472, %v516_v57  ;;  %v418_v62 = vsub.f32 %v398_v56, %v408_v55 }
 0x21e   :  { %v395_v61 = vmul.f32 0.6931472, %v518_v59 }
 0x21f   :  { %v399_v0 = vadd.f32 %v393_v60, %v359_v24  ;;  %v423_v7 = vsel %vm422_vm3, %v418_v62, 0.0 }
 0x220   :  { %v520_v1 = vpop.eup %519  ;;  %v400_v2 = vadd.f32 %v395_v61, %v362_v25 }
 0x221   :  { %v397_v3 = vmul.f32 0.6931472, %v520_v1  ;;  %v419_v4 = vsub.f32 %v399_v0, %v411_v58 }
 0x222   :  { %v420_v5 = vsub.f32 %v400_v2, %v414_v63 }
 0x223   :  { %v424_v8 = vsel %vm422_vm3, %v419_v4, 0.0  ;;  %v401_v9 = vadd.f32 %v397_v3, %v365_v30 }
 0x224   :  { %v425_v10 = vadd.f32 %v424_v8, %v423_v7  ;;  %v426_v11 = vsel %vm422_vm3, %v420_v5, 0.0 }
 0x225   :  { %v421_v12 = vsub.f32 %v401_v9, %v417_v6 }
 0x226   :  { %v427_v13 = vadd.f32 %v426_v11, %v425_v10 }
 0x227   :  { %v428_v14 = vsel %vm422_vm3, %v421_v12, 0.0 }
 0x228   :  { %v429_v15 = vadd.f32 %v428_v14, %v427_v13 }
 0x22a   :  { %430 = vadd.xlane.f32.xlu0 %v429_v15 }
 0x2b3   :  { %v431_v16 = vpop.xlane.xlu0 %430 }
 0x2b4   :  { %v432_v17 = vrot.slane %v431_v16, 4 }
 0x2b6   :  { %v433_v18 = vadd.f32 %v432_v17, %v431_v16 }
 0x2b8   :  { %v434_v19 = vrot.slane %v433_v18, 2 }
 0x2ba   :  { %v435_v20 = vadd.f32 %v434_v19, %v433_v18 }
 0x2bc   :  { %v436_v21 = vrot.slane %v435_v20, 1 }
 0x2be   :  { %v437_v22 = vadd.f32 %v436_v21, %v435_v20 }
 0x2c0   :  { %496 = vpush %v437_v22 }
 0x2f1   :  { %s497_s21 = spop %496 }
 0x2f2   :  { %s439_s22 = smul.f32 0.03125, %s497_s21 }
 0x2f4   :  { %v440_v23 = vstv %s439_s22 }
 0x2f5   :  { %443 = vst.msk [vmem:[#allocation7] sm:$0x1] %vm442_vm4, %v440_v23 }
 0x2f6   :  { %572 = shalt.err (!%p569_p0)
}
 0x2f7   :  { %453 = dma.vmem_to_hbm [thread:$0]  %s451_s1, 16, %s644_s2, [#allocation4]  }
 0x2f8   :  { %585 = dma.done.wait [#allocation4], 16  }
 0x2f9   :  { %586 = vsyncadd [#allocation4], 4294967280 }
 0x2fa   :  { %457 = vsyncpa [#allocation3], 1 }
 0x2fb   :  { %458 = vsyncpa [#allocation6], 1 }
 0x2fc   :  { %459 = vsyncpa [#allocation4], 1 }

</bundles_post_ra>
